<compile_context>
chip_gen: v5e
topology: v5e:2x2
jax: 0.10.0
libtpu: 0.0.40
codegen_flags: <defaults>
</compile_context>

<pallas_src>
import functools

import jax
import jax.numpy as jnp
from jax.experimental import pallas as pl
from jax.experimental.pallas import tpu as pltpu


def _round_up(x: int, m: int) -> int:
    return (x + m - 1) // m * m


def _cbm_kernel(scale_ref, img_ref, txt_t_ref, wcbl_t_ref, whead_t_ref,
                cbl_out_ref, head_out_ref, *, compute_dtype):
    # scale_ref lives in SMEM: shape (1,)
    img = img_ref[...]                                      # [TB, D] f32

    # Fold logit_scale into the per-row inverse norm: one [TB,1] column mul
    # instead of a broadcast multiply over the [TB, Cp] logits.
    inv = scale_ref[0] * jax.lax.rsqrt(
        jnp.sum(img * img, axis=-1, keepdims=True))
    img_n = (img * inv).astype(compute_dtype)               # [TB, D]

    # logits_per_image = scale * img_n @ txt_n.T
    # (txt pre-normalized + pre-transposed in the wrapper -> plain contraction)
    logits = jnp.dot(img_n, txt_t_ref[...],
                     preferred_element_type=jnp.float32)    # [TB, Cp] f32

    # CBL: nn.Linear(C, C, bias=False) with pre-transposed weight: x @ W_cbl.T
    cbl = jnp.dot(logits.astype(compute_dtype), wcbl_t_ref[...],
                  preferred_element_type=jnp.float32)       # [TB, Cp] f32
    cbl_out_ref[...] = cbl.astype(cbl_out_ref.dtype)

    # Head: nn.Linear(C, K, bias=False) with pre-transposed weight.
    head = jnp.dot(cbl.astype(compute_dtype), whead_t_ref[...],
                   preferred_element_type=jnp.float32)      # [TB, Kp] f32
    head_out_ref[...] = head.astype(head_out_ref.dtype)


def base_cb_model_forward(img_emb, txt_emb, logit_scale, w_cbl, w_head,
                          *, matmul_dtype=jnp.float32):
    """Returns (cbl_out, head_out) exactly like BaseCBModel.forward.

    img_emb : [B, D]  backbone image embeddings (pre-normalization)
    txt_emb : [C, D]  backbone text embeddings of the concepts
    w_cbl   : [C, C]  nn.Linear(C, C, bias=False).weight  (PyTorch layout)
    w_head  : [K, C]  nn.Linear(C, K, bias=False).weight  (PyTorch layout)
    """
    B, D = img_emb.shape
    C, _ = txt_emb.shape
    K, _ = w_head.shape

    # ---- lane-dense padding of the output feature dims (unmasked vst) -------
    Cp = _round_up(C, 128)
    Kp = _round_up(K, 128)

    # ---- wrapper-side layout prep (one fused XLA op each) --------------------
    # Normalize concept-text embeddings once (reused by every batch tile) and
    # pre-transpose every RHS so the kernel does plain x @ W with no `.T`.
    txt_n = txt_emb * jax.lax.rsqrt(
        jnp.sum(txt_emb * txt_emb, axis=-1, keepdims=True))
    txt_t = jnp.zeros((D, Cp), matmul_dtype).at[:, :C].set(
        txt_n.T.astype(matmul_dtype))
    wcbl_t = jnp.zeros((Cp, Cp), matmul_dtype).at[:C, :C].set(
        w_cbl.T.astype(matmul_dtype))
    whead_t = jnp.zeros((Cp, Kp), matmul_dtype).at[:C, :K].set(
        w_head.T.astype(matmul_dtype))

    # ---- batch tile sized for VMEM (conservative: fits v7x's 64 MiB) --------
    itemsize = jnp.dtype(matmul_dtype).itemsize
    resident = (D * Cp + Cp * Cp + Cp * Kp) * itemsize       # txt_t + weights
    # per-row VMEM: double-buffered img tile + double-buffered outputs +
    # f32 intermediates (img_n, logits, cbl, head).
    per_row = 2 * 4 * D + 2 * 4 * (Cp + Kp) + 4 * (D + 2 * Cp + Kp)
    budget = 24 * 2 ** 20                                    # stay under the
    tb = max(8, (budget - 2 * resident) // max(per_row, 1))  # 32 MiB default
    tb = min(tb, 1024, _round_up(B, 8))
    # MXU-friendly M tile: multiples of 256 on v6e/v7x when big enough.
    tb = (tb // 256) * 256 if tb >= 256 else (tb // 8) * 8
    TB = int(max(tb, 8))

    Bp = _round_up(B, TB)
    if Bp != B:
        # Pad with ones (not zeros) so rsqrt of padded rows stays finite;
        # padded rows are sliced away below.
        img_p = jnp.ones((Bp, D), img_emb.dtype).at[:B].set(img_emb)
    else:
        img_p = img_emb

    scale_arr = jnp.asarray([logit_scale], dtype=jnp.float32)

    nb = Bp // TB
    grid_spec = pltpu.PrefetchScalarGridSpec(
        num_scalar_prefetch=0,
        grid=(nb,),
        in_specs=[
            pl.BlockSpec(memory_space=pltpu.SMEM),        # logit_scale (scalar)
            pl.BlockSpec((TB, D), lambda i: (i, 0)),      # img tile (pipelined)
            pl.BlockSpec((D, Cp), lambda i: (0, 0)),      # txt_n.T   (resident)
            pl.BlockSpec((Cp, Cp), lambda i: (0, 0)),     # W_cbl.T   (resident)
            pl.BlockSpec((Cp, Kp), lambda i: (0, 0)),     # W_head.T  (resident)
        ],
        out_specs=[
            pl.BlockSpec((TB, Cp), lambda i: (i, 0)),     # cbl_out tile
            pl.BlockSpec((TB, Kp), lambda i: (i, 0)),     # head_out tile
        ],
    )

    out_shapes = (
        jax.ShapeDtypeStruct((Bp, Cp), jnp.float32),
        jax.ShapeDtypeStruct((Bp, Kp), jnp.float32),
    )

    # Advisory cost estimate for XLA's scheduler.
    flops = int(2 * Bp * Cp * (D + Cp + Kp))
    bytes_accessed = int(img_p.size * 4
                         + (txt_t.size + wcbl_t.size + whead_t.size) * itemsize
                         + Bp * (Cp + Kp) * 4)
    cost = pl.CostEstimate(flops=flops, transcendentals=int(Bp),
                           bytes_accessed=bytes_accessed)

    params = {"dimension_semantics": ("parallel",)}
    vmem_need = 2 * resident + TB * per_row
    if vmem_need > 28 * 2 ** 20:
        params["vmem_limit_bytes"] = int(min(vmem_need * 5 // 4, 112 * 2 ** 20))

    cbl_p, head_p = pl.pallas_call(
        functools.partial(_cbm_kernel, compute_dtype=matmul_dtype),
        out_shape=out_shapes,
        grid_spec=grid_spec,
        compiler_params=pltpu.CompilerParams(**params),
        cost_estimate=cost,
    )(scale_arr, img_p, txt_t, wcbl_t, whead_t)

    return cbl_p[:B, :C], head_p[:B, :K]


def _reference(img_emb, txt_emb, logit_scale, w_cbl, w_head):
    img_n = img_emb / jnp.linalg.norm(img_emb, axis=-1, keepdims=True)
    txt_n = txt_emb / jnp.linalg.norm(txt_emb, axis=-1, keepdims=True)
    logits = logit_scale * img_n @ txt_n.T
    cbl = logits @ w_cbl.T
    head = cbl @ w_head.T
    return cbl, head


if __name__ == "__main__":
    # Small deterministic shapes consistent with the module:
    B = 8            # batch (images)
    D = 32           # backbone embedding dim
    C = 16           # num_concepts
    K = 8            # num_classes

    key = jax.random.PRNGKey(0)
    k_img, k_txt, k_cbl, k_head = jax.random.split(key, 4)

    img_emb = jax.random.normal(k_img, (B, D), dtype=jnp.float32)
    txt_emb = jax.random.normal(k_txt, (C, D), dtype=jnp.float32)
    logit_scale = 100.0  # exp(log_logit_scale) ~ CLIP default

    # nn.Linear(bias=False) weights, +-1/sqrt(fan_in) uniform like PyTorch.
    bound = 1.0 / jnp.sqrt(C)
    w_cbl = jax.random.uniform(k_cbl, (C, C), jnp.float32, -bound, bound)
    w_head = jax.random.uniform(k_head, (K, C), jnp.float32, -bound, bound)

    ref_cbl, ref_head = _reference(img_emb, txt_emb, logit_scale, w_cbl, w_head)

    # f32 path: bit-tight vs. the reference.
    cbl_out, head_out = base_cb_model_forward(img_emb, txt_emb, logit_scale,
                                              w_cbl, w_head)
    jax.block_until_ready((cbl_out, head_out))
    assert cbl_out.shape == (B, C) and head_out.shape == (B, K)
    assert jnp.allclose(cbl_out, ref_cbl, atol=1e-3, rtol=1e-3)
    assert jnp.allclose(head_out, ref_head, atol=1e-3, rtol=1e-3)

    # bf16-MXU path (2x MXU throughput on v6e/v7x, f32 accumulation).
    # logit_scale=100 amplifies bf16 rounding -> looser sanity tolerance.
    cbl_bf, head_bf = base_cb_model_forward(img_emb, txt_emb, logit_scale,
                                            w_cbl, w_head,
                                            matmul_dtype=jnp.bfloat16)
    jax.block_until_ready((cbl_bf, head_bf))
    assert jnp.allclose(cbl_bf, ref_cbl, atol=1.0, rtol=0.1)
    assert jnp.allclose(head_bf, ref_head, atol=1.0, rtol=0.1)

    print("KERNEL_OK")
</pallas_src>

<mosaic_0001>
module attributes {stable_mosaic.version = 11 : i64} {
  func.func @_cbm_kernel(%arg0: i32, %arg1: memref<1xf32, #tpu.memory_space<smem>>, %arg2: memref<8x32xf32, #tpu.memory_space<vmem>>, %arg3: memref<32x128xf32, #tpu.memory_space<vmem>>, %arg4: memref<128x128xf32, #tpu.memory_space<vmem>>, %arg5: memref<128x128xf32, #tpu.memory_space<vmem>>, %arg6: memref<8x128xf32, #tpu.memory_space<vmem>>, %arg7: memref<8x128xf32, #tpu.memory_space<vmem>>) attributes {dimension_semantics = [#tpu.dimension_semantics<parallel>], iteration_bounds = array<i64: 1>, scalar_prefetch = 0 : i64, scratch_operands = 0 : i64, tpu.core_type = #tpu.core_type<tc>, window_params = [{transform_indices = @transform_0, window_bounds = array<i64: 1>}, {transform_indices = @transform_1, window_bounds = array<i64: 8, 32>}, {pipeline_mode = #tpu.pipeline_mode<synchronous>, transform_indices = @transform_2, window_bounds = array<i64: 32, 128>}, {pipeline_mode = #tpu.pipeline_mode<synchronous>, transform_indices = @transform_3, window_bounds = array<i64: 128, 128>}, {pipeline_mode = #tpu.pipeline_mode<synchronous>, transform_indices = @transform_4, window_bounds = array<i64: 128, 128>}, {transform_indices = @transform_5, window_bounds = array<i64: 8, 128>}, {transform_indices = @transform_6, window_bounds = array<i64: 8, 128>}]} {
    %c0 = arith.constant 0 : index
    %c0_0 = arith.constant 0 : index
    %0 = vector.load %arg2[%c0, %c0_0] : memref<8x32xf32, #tpu.memory_space<vmem>>, vector<8x32xf32>
    %c0_1 = arith.constant 0 : index
    %1 = memref.load %arg1[%c0_1] : memref<1xf32, #tpu.memory_space<smem>>
    %2 = arith.mulf %0, %0 : vector<8x32xf32>
    %cst = arith.constant dense<0.000000e+00> : vector<8xf32>
    %3 = vector.multi_reduction <add>, %2, %cst [1] : vector<8x32xf32> to vector<8xf32>
    %4 = vector.shape_cast %3 : vector<8xf32> to vector<8x1xf32>
    %5 = math.rsqrt %4 : vector<8x1xf32>
    %6 = vector.broadcast %1 : f32 to vector<8x1xf32>
    %7 = arith.mulf %6, %5 : vector<8x1xf32>
    %8 = vector.broadcast %7 : vector<8x1xf32> to vector<8x32xf32>
    %9 = arith.mulf %0, %8 : vector<8x32xf32>
    %c0_2 = arith.constant 0 : index
    %c0_3 = arith.constant 0 : index
    %10 = vector.load %arg3[%c0_2, %c0_3] : memref<32x128xf32, #tpu.memory_space<vmem>>, vector<32x128xf32>
    %cst_4 = arith.constant dense<0.000000e+00> : vector<8x128xf32>
    %11 = tpu.matmul %9, %10, %cst_4 {dimension_numbers = #tpu.dot_dimension_numbers<[1], [0], [0], [1], [0, 0, 1, 1], [], []>} : vector<8x32xf32>, vector<32x128xf32>, vector<8x128xf32> -> vector<8x128xf32>
    %c0_5 = arith.constant 0 : index
    %c0_6 = arith.constant 0 : index
    %12 = vector.load %arg4[%c0_5, %c0_6] : memref<128x128xf32, #tpu.memory_space<vmem>>, vector<128x128xf32>
    %cst_7 = arith.constant dense<0.000000e+00> : vector<8x128xf32>
    %13 = tpu.matmul %11, %12, %cst_7 {dimension_numbers = #tpu.dot_dimension_numbers<[1], [0], [0], [1], [0, 0, 1, 1], [], []>} : vector<8x128xf32>, vector<128x128xf32>, vector<8x128xf32> -> vector<8x128xf32>
    %c0_8 = arith.constant 0 : index
    %c0_9 = arith.constant 0 : index
    %14 = vector.load %arg6[%c0_8, %c0_9] : memref<8x128xf32, #tpu.memory_space<vmem>>, vector<8x128xf32>
    tpu.vector_store %arg6[%c0_8, %c0_9], %13 {strides = array<i32>} : memref<8x128xf32, #tpu.memory_space<vmem>>, vector<8x128xf32>,
    %c0_10 = arith.constant 0 : index
    %c0_11 = arith.constant 0 : index
    %15 = vector.load %arg5[%c0_10, %c0_11] : memref<128x128xf32, #tpu.memory_space<vmem>>, vector<128x128xf32>
    %cst_12 = arith.constant dense<0.000000e+00> : vector<8x128xf32>
    %16 = tpu.matmul %13, %15, %cst_12 {dimension_numbers = #tpu.dot_dimension_numbers<[1], [0], [0], [1], [0, 0, 1, 1], [], []>} : vector<8x128xf32>, vector<128x128xf32>, vector<8x128xf32> -> vector<8x128xf32>
    %c0_13 = arith.constant 0 : index
    %c0_14 = arith.constant 0 : index
    %17 = vector.load %arg7[%c0_13, %c0_14] : memref<8x128xf32, #tpu.memory_space<vmem>>, vector<8x128xf32>
    tpu.vector_store %arg7[%c0_13, %c0_14], %16 {strides = array<i32>} : memref<8x128xf32, #tpu.memory_space<vmem>>, vector<8x128xf32>,
    return
  }
  func.func @transform_0(%arg0: i32) -> i32 {
    %c0_i32 = arith.constant 0 : i32
    %c0_i32_0 = arith.constant 0 : i32
    return %c0_i32 : i32
  }
  func.func @transform_1(%arg0: i32) -> (i32, i32) {
    %c0_i32 = arith.constant 0 : i32
    %c0_i32_0 = arith.constant 0 : i32
    return %arg0, %c0_i32 : i32, i32
  }
  func.func @transform_2(%arg0: i32) -> (i32, i32) {
    %c0_i32 = arith.constant 0 : i32
    %c0_i32_0 = arith.constant 0 : i32
    %c0_i32_1 = arith.constant 0 : i32
    return %c0_i32, %c0_i32_0 : i32, i32
  }
  func.func @transform_3(%arg0: i32) -> (i32, i32) {
    %c0_i32 = arith.constant 0 : i32
    %c0_i32_0 = arith.constant 0 : i32
    %c0_i32_1 = arith.constant 0 : i32
    return %c0_i32, %c0_i32_0 : i32, i32
  }
  func.func @transform_4(%arg0: i32) -> (i32, i32) {
    %c0_i32 = arith.constant 0 : i32
    %c0_i32_0 = arith.constant 0 : i32
    %c0_i32_1 = arith.constant 0 : i32
    return %c0_i32, %c0_i32_0 : i32, i32
  }
  func.func @transform_5(%arg0: i32) -> (i32, i32) {
    %c0_i32 = arith.constant 0 : i32
    %c0_i32_0 = arith.constant 0 : i32
    return %arg0, %c0_i32 : i32, i32
  }
  func.func @transform_6(%arg0: i32) -> (i32, i32) {
    %c0_i32 = arith.constant 0 : i32
    %c0_i32_0 = arith.constant 0 : i32
    return %arg0, %c0_i32 : i32, i32
  }
}

</mosaic_0001>

<bundles_post_ra>
// kernel: tpu_custom_call.1
= control target key start
LH: loop header
LB: loop body
LE: loop exit
PB: predicated region body
PF: predicated region fallthrough
CT: control target
= control target key end

     0   :  { %13 = vsyncpa [#allocation4], 0  ;;  %s473_s0 = inlined_call_operand.<no memory space> [shape: f32[1], index: 0, kind: input, shape index: {}]   ;;  %s474_s1 = inlined_call_operand.hbm [shape: f32[8,32], index: 1, kind: input, shape index: {}]   ;;  %s475_s2 = inlined_call_operand.hbm [shape: f32[32,128], index: 2, kind: input, shape index: {}]   ;;  %s476_s3 = inlined_call_operand.hbm [shape: f32[128,128], index: 3, kind: input, shape index: {}]   ;;  %s477_s4 = inlined_call_operand.hbm [shape: f32[128,128], index: 4, kind: input, shape index: {}]   ;;  %s478_s5 = inlined_call_operand.hbm [shape: f32[8,128], index: 5, kind: output, shape index: {0}]   ;;  %s479_s6 = inlined_call_operand.hbm [shape: f32[8,128], index: 6, kind: output, shape index: {1}]  }
   0x1   :  { %14 = vsyncpa [#allocation7], 0 }
   0x2   :  { %15 = vsyncpa [#allocation10], 0 }
   0x3   :  { %16 = vsyncpa [#allocation5], 0  ;;  %s35_s23 = sshll.u32 %s475_s2, 4  ;;  %s36_s23 = int_to_ptr.hbm [resolvable:$true] %s35_s23 }
   0x4   :  { %17 = vsyncpa [#allocation13], 0  ;;  %s407_s24 = smov [#allocation6]   ;;  %s25_s28 = sshll.u32 %s474_s1, 4  ;;  %s26_s28 = int_to_ptr.hbm [resolvable:$true] %s25_s28 }
   0x5   :  { %s37_s25 = sshll.u32 %s407_s24, 4  ;;  %s408_s29 = smov 128   ;;  %s38_s25 = int_to_ptr.vmem [resolvable:$true] %s37_s25 }
   0x6   :  { %s409_s30 = smov 8   ;;  %s410_s7 = smov [#allocation3]  }
   0x7   :  { %43 = dma.hbm_to_vmem [thread:$0]  %s36_s23, 512, %s38_s25, [#allocation7], %s408_s29, %s408_s29, %s409_s30  }
   0x8   :  { %s27_s8 = sshll.u32 %s410_s7, 4  ;;  %s48_s11 = sshll.u32 %s476_s3, 4  ;;  %s28_s8 = int_to_ptr.vmem [resolvable:$true] %s27_s8  ;;  %s49_s11 = int_to_ptr.hbm [resolvable:$true] %s48_s11 }
   0x9   :  { %30 = dma.hbm_to_vmem [thread:$0]  %s26_s28, 128, %s28_s8, [#allocation4]  }
   0xa   :  { %s61_s13 = sshll.u32 %s477_s4, 4  ;;  %s411_s14 = smov [#allocation8]   ;;  %s62_s13 = int_to_ptr.hbm [resolvable:$true] %s61_s13 }
   0xb   :  { %s50_s15 = sshll.u32 %s411_s14, 4  ;;  %s412_s1 = smov [#allocation9]   ;;  %s51_s15 = int_to_ptr.vmem [resolvable:$true] %s50_s15 }
   0xc   :  { %56 = dma.hbm_to_vmem [thread:$0]  %s49_s11, 2048, %s51_s15, [#allocation7], %s408_s29, %s408_s29, %s409_s30  }
   0xd   :  { %s63_s16 = sshll.u32 %s412_s1, 4  ;;  %s64_s16 = int_to_ptr.vmem [resolvable:$true] %s63_s16 }
   0xe   :  { %69 = dma.hbm_to_vmem [thread:$0]  %s62_s13, 2048, %s64_s16, [#allocation10], %s408_s29, %s408_s29, %s409_s30  }
   0xf   :  { %397 = dma.done.wait [#allocation4], 128  }
  0x10   :  { %398 = vsyncadd [#allocation4], 4294967168 }
  0x11   :  { %399 = dma.done.wait [#allocation7], 2560  }
  0x12   :  { %400 = vsyncadd [#allocation7], 4294964736 }
  0x13   :  { %401 = dma.done.wait [#allocation10], 2048  }
  0x14   :  { %402 = vsyncadd [#allocation10], 4294965248  ;;  %v86_v0 = vld [vmem:[#allocation3] sm:$0xff]  ;;  %vm89_vm0 = vcmask 261120   ;;  %v108_v4 = vld [vmem:[#allocation6 + $0x10] sm:$0xff]  ;;  %v103_v28 = vstv %s473_s0  ;;  %s413_s0 = smov [#allocation11]  }
  0x15   :  { %v88_v1 = vmul.f32 %v86_v0, %v86_v0  ;;  %v109_v3 = vld [vmem:[#allocation6 + $0x18] sm:$0xff]  ;;  %v107_v5 = vld [vmem:[#allocation6 + $0x8] sm:$0xff]  ;;  %v106_v6 = vld [vmem:[#allocation6] sm:$0xff]  ;;  %s212_s17 = sshll.u32 %s413_s0, 4  ;;  %s214_s20 = sshll.u32 %s478_s5, 4  ;;  %s213_s17 = int_to_ptr.vmem [resolvable:$true] %s212_s17  ;;  %s215_s20 = int_to_ptr.hbm [resolvable:$true] %s214_s20 }
  0x16   :  { %125 = vmatpush.msra.mxu0 %v109_v3  ;;  %v148_v7 = vld [vmem:[#allocation8 + $0x78] sm:$0xff]  ;;  %v147_v8 = vld [vmem:[#allocation8 + $0x70] sm:$0xff]  ;;  %v146_v9 = vld [vmem:[#allocation8 + $0x68] sm:$0xff]  ;;  %s414_s21 = smov [#allocation12]   ;;  %s225_s25 = sshll.u32 %s479_s6, 4  ;;  %s226_s25 = int_to_ptr.hbm [resolvable:$true] %s225_s25 }
  0x17   :  { %v90_v2 = vsel %vm89_vm0, %v88_v1, 0.0  ;;  %149 = vmatpush.msra.mxu1 %v148_v7  ;;  %v145_v10 = vld [vmem:[#allocation8 + $0x60] sm:$0xff]  ;;  %v144_v11 = vld [vmem:[#allocation8 + $0x58] sm:$0xff]  ;;  %v143_v12 = vld [vmem:[#allocation8 + $0x50] sm:$0xff]  ;;  %s223_s22 = sshll.u32 %s414_s21, 4  ;;  %s224_s22 = int_to_ptr.vmem [resolvable:$true] %s223_s22 }
  0x18   :  { %91 = vadd.xlane.f32.xlu0 %v90_v2  ;;  %126 = vmatpush.msra.mxu0 %v108_v4  ;;  %v142_v14 = vld [vmem:[#allocation8 + $0x48] sm:$0xff]  ;;  %v141_v15 = vld [vmem:[#allocation8 + $0x40] sm:$0xff]  ;;  %v140_v16 = vld [vmem:[#allocation8 + $0x38] sm:$0xff] }
  0x19   :  { %150 = vmatpush.msra.mxu1 %v147_v8  ;;  %v139_v18 = vld [vmem:[#allocation8 + $0x30] sm:$0xff]  ;;  %v138_v20 = vld [vmem:[#allocation8 + $0x28] sm:$0xff]  ;;  %v137_v22 = vld [vmem:[#allocation8 + $0x20] sm:$0xff] }
  0x1a   :  { %127 = vmatpush.msra.mxu0 %v107_v5  ;;  %v136_v24 = vld [vmem:[#allocation8 + $0x18] sm:$0xff]  ;;  %v135_v26 = vld [vmem:[#allocation8 + $0x10] sm:$0xff]  ;;  %v134_v29 = vld [vmem:[#allocation8 + $0x8] sm:$0xff] }
  0x1b   :  { %151 = vmatpush.msra.mxu1 %v146_v9  ;;  %v133_v33 = vld [vmem:[#allocation8] sm:$0xff]  ;;  %v185_v34 = vld [vmem:[#allocation9 + $0x78] sm:$0xff]  ;;  %v184_v35 = vld [vmem:[#allocation9 + $0x70] sm:$0xff] }
  0x1c   :  { %128 = vmatpush.msra.mxu0 %v106_v6  ;;  %186 = vmatpush.msra.mxu2 %v185_v34  ;;  %v183_v36 = vld [vmem:[#allocation9 + $0x68] sm:$0xff]  ;;  %v182_v37 = vld [vmem:[#allocation9 + $0x60] sm:$0xff]  ;;  %v181_v38 = vld [vmem:[#allocation9 + $0x58] sm:$0xff] }
  0x1d   :  { %152 = vmatpush.msra.mxu1 %v145_v10  ;;  %v180_v39 = vld [vmem:[#allocation9 + $0x50] sm:$0xff]  ;;  %v179_v40 = vld [vmem:[#allocation9 + $0x48] sm:$0xff]  ;;  %v178_v41 = vld [vmem:[#allocation9 + $0x40] sm:$0xff] }
  0x1e   :  { %187 = vmatpush.msra.mxu2 %v184_v35  ;;  %v177_v42 = vld [vmem:[#allocation9 + $0x38] sm:$0xff]  ;;  %v176_v43 = vld [vmem:[#allocation9 + $0x30] sm:$0xff]  ;;  %v175_v44 = vld [vmem:[#allocation9 + $0x28] sm:$0xff] }
  0x1f   :  { %153 = vmatpush.msra.mxu1 %v144_v11  ;;  %v174_v45 = vld [vmem:[#allocation9 + $0x20] sm:$0xff]  ;;  %v173_v46 = vld [vmem:[#allocation9 + $0x18] sm:$0xff]  ;;  %v172_v47 = vld [vmem:[#allocation9 + $0x10] sm:$0xff] }
  0x20   :  { %188 = vmatpush.msra.mxu2 %v183_v36  ;;  %v171_v48 = vld [vmem:[#allocation9 + $0x8] sm:$0xff]  ;;  %v170_v50 = vld [vmem:[#allocation9] sm:$0xff] }
  0x21   :  { %154 = vmatpush.msra.mxu1 %v143_v12 }
  0x22   :  { %189 = vmatpush.msra.mxu2 %v182_v37 }
  0x23   :  { %155 = vmatpush.msra.mxu1 %v142_v14 }
  0x24   :  { %190 = vmatpush.msra.mxu2 %v181_v38 }
  0x25   :  { %156 = vmatpush.msra.mxu1 %v141_v15 }
  0x26   :  { %191 = vmatpush.msra.mxu2 %v180_v39 }
  0x27   :  { %157 = vmatpush.msra.mxu1 %v140_v16 }
  0x28   :  { %192 = vmatpush.msra.mxu2 %v179_v40 }
  0x29   :  { %158 = vmatpush.msra.mxu1 %v139_v18 }
  0x2a   :  { %193 = vmatpush.msra.mxu2 %v178_v41 }
  0x2b   :  { %159 = vmatpush.msra.mxu1 %v138_v20 }
  0x2c   :  { %194 = vmatpush.msra.mxu2 %v177_v42 }
  0x2d   :  { %160 = vmatpush.msra.mxu1 %v137_v22 }
  0x2e   :  { %195 = vmatpush.msra.mxu2 %v176_v43 }
  0x2f   :  { %161 = vmatpush.msra.mxu1 %v136_v24 }
  0x30   :  { %196 = vmatpush.msra.mxu2 %v175_v44 }
  0x31   :  { %162 = vmatpush.msra.mxu1 %v135_v26 }
  0x32   :  { %197 = vmatpush.msra.mxu2 %v174_v45 }
  0x33   :  { %163 = vmatpush.msra.mxu1 %v134_v29 }
  0x34   :  { %198 = vmatpush.msra.mxu2 %v173_v46 }
  0x35   :  { %164 = vmatpush.msra.mxu1 %v133_v33 }
  0x36   :  { %199 = vmatpush.msra.mxu2 %v172_v47 }
  0x38   :  { %200 = vmatpush.msra.mxu2 %v171_v48 }
  0x3a   :  { %201 = vmatpush.msra.mxu2 %v170_v50 }
  0x8b   :  { %v92_v13 = vpop.xlane.xlu0 %91 }
  0x8c   :  { %251 = vrsqrt.f32 %v92_v13  ;;  %vm99_vm2 = vweird.f32 %v92_v13 }
  0x92   :  { %v252_v17 = vpop.eup %251 }
  0x93   :  { %v94_v19 = vmul.f32 %v252_v17, %v92_v13  ;;  %vm100_vm1 = vweird.f32 %v252_v17 }
  0x94   :  { %vm101_vm3 = vmor %vm99_vm2, %vm100_vm1 }
  0x95   :  { %v95_v21 = vmul.f32 %v252_v17, %v94_v19 }
  0x97   :  { %v96_v23 = vmul.f32 0.5, %v95_v21 }
  0x99   :  { %v97_v25 = vsub.f32 1.5, %v96_v23 }
  0x9b   :  { %v98_v27 = vmul.f32 %v252_v17, %v97_v25 }
  0x9d   :  { %v102_v30 = vsel %vm101_vm3, %v252_v17, %v98_v27 }
  0x9e   :  { %v104_v31 = vmul.f32 %v103_v28, %v102_v30 }
  0xa0   :  { %v105_v32 = vmul.f32 %v104_v31, %v86_v0 }
  0xa2   :  { %242 = vmatmul.msk.f32.vlgmr.msra.gmra.mxu0 %vm89_vm0, %v105_v32 }
 0x11f   :  { %v130_v49 = vpop.f32.mrf.mxu0 }
 0x120   :  { %165 = vmatmul.f32.vlgmr.msra.gmra.mxu1 %v130_v49 }
 0x19d   :  { %v166_v51 = vpop.f32.mrf.mxu1 }
 0x19e   :  { %169 = vst [vmem:[#allocation11] sm:$0xff] %v166_v51  ;;  %202 = vmatmul.f32.vlgmr.msra.gmra.mxu2 %v166_v51 }
 0x19f   :  { %217 = dma.vmem_to_hbm [thread:$0]  %s213_s17, 128, %s215_s20, [#allocation5]  }
 0x221   :  { %v203_v52 = vpop.f32.mrf.mxu2 }
 0x222   :  { %206 = vst [vmem:[#allocation12] sm:$0xff] %v203_v52 }
 0x223   :  { %228 = dma.vmem_to_hbm [thread:$0]  %s224_s22, 128, %s226_s25, [#allocation13]  }
 0x224   :  { %403 = dma.done.wait [#allocation5], 128  }
 0x225   :  { %404 = vsyncadd [#allocation5], 4294967168 }
 0x226   :  { %405 = dma.done.wait [#allocation13], 128  }
 0x227   :  { %406 = vsyncadd [#allocation13], 4294967168 }
 0x228   :  { %237 = vsyncpa [#allocation4], 1 }
 0x229   :  { %238 = vsyncpa [#allocation7], 1 }
 0x22a   :  { %239 = vsyncpa [#allocation10], 1 }
 0x22b   :  { %240 = vsyncpa [#allocation5], 1 }
 0x22c   :  { %241 = vsyncpa [#allocation13], 1 }

</bundles_post_ra>
